<compile_context>
chip_gen: v6e
topology: v6e:2x2x1
jax: 0.10.0
libtpu: 0.0.40
codegen_flags: <defaults>
</compile_context>

<pallas_src>
import functools
import math

import jax
import jax.numpy as jnp
from jax import lax
from jax.experimental import pallas as pl
from jax.experimental.pallas import tpu as pltpu

LN_EPS = 1e-5      # torch F.layer_norm default
_LANE = 128
_SUBLANE = 8

_SINGLE_BUFFER_WEIGHTS_OK = None   # lazily resolved: is pl.Buffered(1) supported?


def _round_up(x, m):
    return (x + m - 1) // m * m


def _gelu_exact(x):
    # nn.GELU() default in PyTorch is the exact erf-based GELU.
    return 0.5 * x * (1.0 + lax.erf(x * (1.0 / math.sqrt(2.0))))


def _gelu_tanh(x):
    # tanh approximation -> EUP (separate VLIW slot).  Gated behind a flag since it
    # changes numerics vs torch's exact erf GELU.
    c = math.sqrt(2.0 / math.pi)
    return 0.5 * x * (1.0 + jnp.tanh(c * (x + 0.044715 * x * x * x)))


def _prediction_head_kernel(x_ref, w1_ref, b1_ref, w2_ref, b2_ref, o_ref,
                            *, norm_input, use_tanh_gelu):
    # x_ref:  (tm, D)   token tile
    # w1_ref: (D, Hp)   first Linear weight, (in, out) layout, padded, compute dtype
    # b1_ref: (1, Hp)   f32
    # w2_ref: (Hp, Op)  second Linear weight
    # b2_ref: (1, Op)   f32
    # o_ref:  (tm, Op)  lane-dense output tile
    x = x_ref[...].astype(jnp.float32)

    if norm_input:
        # LayerNorm over last dim, no affine (F.layer_norm(x, [D])) -- f32 for accuracy.
        mean = jnp.mean(x, axis=-1, keepdims=True)
        xc = x - mean
        var = jnp.mean(xc * xc, axis=-1, keepdims=True)
        x = xc * lax.rsqrt(var + LN_EPS)

    # Cast activations to the weight dtype (bf16 by default) for the MXU; f32 accum.
    xq = x.astype(w1_ref.dtype)
    h = jnp.dot(xq, w1_ref[...], preferred_element_type=jnp.float32) + b1_ref[...]
    h = _gelu_tanh(h) if use_tanh_gelu else _gelu_exact(h)

    hq = h.astype(w2_ref.dtype)
    out = jnp.dot(hq, w2_ref[...], preferred_element_type=jnp.float32) + b2_ref[...]
    o_ref[...] = out.astype(o_ref.dtype)


def prepare_params(w1, b1, w2, b2, *, compute_dtype=jnp.bfloat16):
    """One-time weight preparation (call this OUTSIDE the per-step forward path).

    torch Linear layout in:  w1 (H, D), b1 (H,), w2 (O, H), b2 (O,).
    Produces:
      - (in, out)-layout weights so the kernel does x @ W (no per-call transpose),
      - hidden/output feature dims padded to multiples of 128 lanes (lane-dense
        intermediates/output; padded columns are exact zeros and are sliced off),
      - weights cast to compute_dtype (bf16 = MXU-native; accumulation stays f32),
        biases kept in f32 (added after the f32 accumulation).
    """
    w1 = jnp.asarray(w1, jnp.float32)
    b1 = jnp.asarray(b1, jnp.float32)
    w2 = jnp.asarray(w2, jnp.float32)
    b2 = jnp.asarray(b2, jnp.float32)
    H, D = w1.shape
    O, H2 = w2.shape
    assert H2 == H and b1.shape == (H,) and b2.shape == (O,)

    Hp = _round_up(H, _LANE)
    Op = _round_up(O, _LANE)
    w1t = jnp.pad(w1.T, ((0, 0), (0, Hp - H))).astype(compute_dtype)        # (D, Hp)
    b1p = jnp.pad(b1, (0, Hp - H)).reshape(1, Hp)                           # (1, Hp) f32
    w2t = jnp.pad(w2.T, ((0, Hp - H), (0, Op - O))).astype(compute_dtype)   # (Hp, Op)
    b2p = jnp.pad(b2, (0, Op - O)).reshape(1, Op)                           # (1, Op) f32
    return w1t, b1p, w2t, b2p, O


def _weight_spec(shape, single_buffer):
    if single_buffer:
        # Constant index_map across the grid -> double-buffering only doubles VMEM;
        # request a single buffer to halve the resident weight footprint.
        return pl.BlockSpec(shape, lambda i: (0, 0), pipeline_mode=pl.Buffered(1))
    return pl.BlockSpec(shape, lambda i: (0, 0))


def prediction_head(x, params, *, norm_input=True, use_tanh_gelu=False, tm=None):
    """PredictionHead forward. x: (B, T, D). params: output of prepare_params()."""
    global _SINGLE_BUFFER_WEIGHTS_OK
    w1t, b1p, w2t, b2p, out_dim = params
    B, T, D = x.shape
    assert w1t.shape[0] == D, "input feature dim mismatch with prepared weights"
    Hp = w1t.shape[1]
    Op = w2t.shape[1]
    N = B * T

    if tm is None:
        # Large row tile: multiple of 128 (v5e MXU M) and 256 (v6e/v7x MXU M); for big
        # N this also leaves >= 2 grid steps so the "parallel" axis can split across
        # v7x's two TensorCores.  Tiny inputs use a single (sublane-aligned) step.
        tm = 512 if N >= 1024 else _round_up(max(N, _SUBLANE), _SUBLANE)
    Np = _round_up(N, tm)

    x2 = x.reshape(N, D)
    if Np != N:
        x2 = jnp.pad(x2, ((0, Np - N), (0, 0)))   # zero rows are harmless, sliced off

    kernel = functools.partial(_prediction_head_kernel,
                               norm_input=norm_input,
                               use_tanh_gelu=use_tanh_gelu)

    def run(single_buffer):
        # Explicit VMEM budget: double-buffered x/out tiles + (single or double)
        # buffered weights, with headroom for the (tm, Hp) f32 intermediate and
        # compiler scratch.  Capped at 64 MiB so the setting is valid on v7x too.
        xb = x2.dtype.itemsize
        io_bytes = 2 * tm * D * xb + 2 * tm * Op * xb
        w_bytes = (w1t.size * w1t.dtype.itemsize + w2t.size * w2t.dtype.itemsize
                   + 4 * (b1p.size + b2p.size))
        n_wbuf = 1 if single_buffer else 2
        vmem_limit = int(min(64 << 20,
                             max(16 << 20,
                                 2 * (io_bytes + n_wbuf * w_bytes) + (8 << 20))))

        return pl.pallas_call(
            kernel,
            out_shape=jax.ShapeDtypeStruct((Np, Op), x.dtype),
            grid_spec=pltpu.PrefetchScalarGridSpec(
                num_scalar_prefetch=0,
                grid=(Np // tm,),
                in_specs=[
                    pl.BlockSpec((tm, D), lambda i: (i, 0)),   # x tile (pipelined)
                    _weight_spec((D, Hp), single_buffer),      # w1 (constant)
                    _weight_spec((1, Hp), single_buffer),      # b1 (constant)
                    _weight_spec((Hp, Op), single_buffer),     # w2 (constant)
                    _weight_spec((1, Op), single_buffer),      # b2 (constant)
                ],
                out_specs=pl.BlockSpec((tm, Op), lambda i: (i, 0)),   # lane-dense
            ),
            compiler_params=pltpu.CompilerParams(
                dimension_semantics=("parallel",),
                vmem_limit_bytes=vmem_limit),
        )(x2, w1t, b1p, w2t, b2p)

    if _SINGLE_BUFFER_WEIGHTS_OK is None:
        try:
            out2 = run(True)
            _SINGLE_BUFFER_WEIGHTS_OK = True
        except Exception:
            # pl.Buffered(1) not accepted by this jax/libtpu build -> default buffering.
            _SINGLE_BUFFER_WEIGHTS_OK = False
            out2 = run(False)
    else:
        out2 = run(_SINGLE_BUFFER_WEIGHTS_OK)

    return out2[:N, :out_dim].reshape(B, T, out_dim)


def _reference(x, w1, b1, w2, b2, *, norm_input=True):
    # Pure-JAX f32 reference mirroring the PyTorch forward (exact erf GELU).
    if norm_input:
        mean = jnp.mean(x, axis=-1, keepdims=True)
        var = jnp.mean((x - mean) ** 2, axis=-1, keepdims=True)
        x = (x - mean) / jnp.sqrt(var + LN_EPS)
    h = _gelu_exact(x @ w1.T + b1)
    return h @ w2.T + b2


if __name__ == "__main__":
    # Small shapes consistent with the module: input_dim=32 -> hidden=16 -> output_dim=8
    B, T, D, O = 2, 8, 32, 8
    H = D // 2

    key = jax.random.PRNGKey(0)
    kx, k1, k2, k3, k4 = jax.random.split(key, 5)

    x = jax.random.normal(kx, (B, T, D), dtype=jnp.float32)

    # torch-Linear-style init (uniform in +/- 1/sqrt(fan_in))
    lim1 = 1.0 / math.sqrt(D)
    lim2 = 1.0 / math.sqrt(H)
    w1 = jax.random.uniform(k1, (H, D), minval=-lim1, maxval=lim1, dtype=jnp.float32)
    b1 = jax.random.uniform(k2, (H,), minval=-lim1, maxval=lim1, dtype=jnp.float32)
    w2 = jax.random.uniform(k3, (O, H), minval=-lim2, maxval=lim2, dtype=jnp.float32)
    b2 = jax.random.uniform(k4, (O,), minval=-lim2, maxval=lim2, dtype=jnp.float32)

    ref = _reference(x, w1, b1, w2, b2, norm_input=True)

    # 1) f32-compute path, norm_input=True: exact check vs the torch-equivalent reference.
    params_f32 = prepare_params(w1, b1, w2, b2, compute_dtype=jnp.float32)
    out = jax.block_until_ready(prediction_head(x, params_f32, norm_input=True))
    assert out.shape == (B, T, O)
    assert jnp.allclose(out, ref, atol=1e-4, rtol=1e-4), "f32 path mismatch vs reference"

    # 2) norm_input=False path (flag honored).
    out_nn = jax.block_until_ready(prediction_head(x, params_f32, norm_input=False))
    ref_nn = _reference(x, w1, b1, w2, b2, norm_input=False)
    assert jnp.allclose(out_nn, ref_nn, atol=1e-4, rtol=1e-4), "norm_input=False mismatch"

    # 3) Default bf16-weight path (MXU-native, f32 accumulation) -- looser tolerance.
    params_bf16 = prepare_params(w1, b1, w2, b2)   # compute_dtype=bf16 by default
    out_bf = jax.block_until_ready(prediction_head(x, params_bf16, norm_input=True))
    max_err = float(jnp.max(jnp.abs(out_bf - ref)))
    assert max_err < 5e-2, f"bf16 path error too large: {max_err}"

    # 4) Non-divisible token count (exercises the row-padding path).
    x_odd = jax.random.normal(kx, (B, 9, D), dtype=jnp.float32)
    out_odd = jax.block_until_ready(prediction_head(x_odd, params_f32, norm_input=True))
    ref_odd = _reference(x_odd, w1, b1, w2, b2, norm_input=True)
    assert out_odd.shape == (B, 9, O)
    assert jnp.allclose(out_odd, ref_odd, atol=1e-4, rtol=1e-4), "padded-N path mismatch"

    print("KERNEL_OK")
</pallas_src>

<mosaic_0001>
module attributes {stable_mosaic.version = 11 : i64} {
  func.func @_prediction_head_kernel(%arg0: i32, %arg1: memref<16x32xf32, #tpu.memory_space<vmem>>, %arg2: memref<32x128xf32, #tpu.memory_space<vmem>>, %arg3: memref<1x128xf32, #tpu.memory_space<vmem>>, %arg4: memref<128x128xf32, #tpu.memory_space<vmem>>, %arg5: memref<1x128xf32, #tpu.memory_space<vmem>>, %arg6: memref<16x128xf32, #tpu.memory_space<vmem>>) attributes {dimension_semantics = [#tpu.dimension_semantics<parallel>], iteration_bounds = array<i64: 1>, scalar_prefetch = 0 : i64, scratch_operands = 0 : i64, tpu.core_type = #tpu.core_type<tc>, window_params = [{transform_indices = @transform_0, window_bounds = array<i64: 16, 32>}, {pipeline_mode = #tpu.pipeline_mode<synchronous>, transform_indices = @transform_1, window_bounds = array<i64: 32, 128>}, {pipeline_mode = #tpu.pipeline_mode<synchronous>, transform_indices = @transform_2, window_bounds = array<i64: 1, 128>}, {pipeline_mode = #tpu.pipeline_mode<synchronous>, transform_indices = @transform_3, window_bounds = array<i64: 128, 128>}, {pipeline_mode = #tpu.pipeline_mode<synchronous>, transform_indices = @transform_4, window_bounds = array<i64: 1, 128>}, {transform_indices = @transform_5, window_bounds = array<i64: 16, 128>}]} {
    %c0 = arith.constant 0 : index
    %c0_0 = arith.constant 0 : index
    %0 = vector.load %arg1[%c0, %c0_0] : memref<16x32xf32, #tpu.memory_space<vmem>>, vector<16x32xf32>
    %cst = arith.constant dense<0.000000e+00> : vector<16xf32>
    %1 = vector.multi_reduction <add>, %0, %cst [1] : vector<16x32xf32> to vector<16xf32>
    %2 = vector.shape_cast %1 : vector<16xf32> to vector<16x1xf32>
    %cst_1 = arith.constant 3.200000e+01 : f32
    %3 = vector.broadcast %cst_1 : f32 to vector<16x1xf32>
    %4 = arith.divf %2, %3 : vector<16x1xf32>
    %5 = vector.broadcast %4 : vector<16x1xf32> to vector<16x32xf32>
    %6 = arith.subf %0, %5 : vector<16x32xf32>
    %7 = arith.mulf %6, %6 : vector<16x32xf32>
    %cst_2 = arith.constant dense<0.000000e+00> : vector<16xf32>
    %8 = vector.multi_reduction <add>, %7, %cst_2 [1] : vector<16x32xf32> to vector<16xf32>
    %9 = vector.shape_cast %8 : vector<16xf32> to vector<16x1xf32>
    %cst_3 = arith.constant 3.200000e+01 : f32
    %10 = vector.broadcast %cst_3 : f32 to vector<16x1xf32>
    %11 = arith.divf %9, %10 : vector<16x1xf32>
    %cst_4 = arith.constant 9.99999974E-6 : f32
    %12 = vector.broadcast %cst_4 : f32 to vector<16x1xf32>
    %13 = arith.addf %11, %12 : vector<16x1xf32>
    %14 = math.rsqrt %13 : vector<16x1xf32>
    %15 = vector.broadcast %14 : vector<16x1xf32> to vector<16x32xf32>
    %16 = arith.mulf %6, %15 : vector<16x32xf32>
    %c0_5 = arith.constant 0 : index
    %c0_6 = arith.constant 0 : index
    %17 = vector.load %arg2[%c0_5, %c0_6] : memref<32x128xf32, #tpu.memory_space<vmem>>, vector<32x128xf32>
    %cst_7 = arith.constant dense<0.000000e+00> : vector<16x128xf32>
    %18 = tpu.matmul %16, %17, %cst_7 {dimension_numbers = #tpu.dot_dimension_numbers<[1], [0], [0], [1], [0, 0, 1, 1], [], []>} : vector<16x32xf32>, vector<32x128xf32>, vector<16x128xf32> -> vector<16x128xf32>
    %c0_8 = arith.constant 0 : index
    %c0_9 = arith.constant 0 : index
    %19 = vector.load %arg3[%c0_8, %c0_9] : memref<1x128xf32, #tpu.memory_space<vmem>>, vector<1x128xf32>
    %20 = vector.broadcast %19 : vector<1x128xf32> to vector<16x128xf32>
    %21 = arith.addf %18, %20 : vector<16x128xf32>
    %cst_10 = arith.constant 5.000000e-01 : f32
    %22 = vector.broadcast %cst_10 : f32 to vector<16x128xf32>
    %23 = arith.mulf %22, %21 : vector<16x128xf32>
    %cst_11 = arith.constant 0.707106769 : f32
    %24 = vector.broadcast %cst_11 : f32 to vector<16x128xf32>
    %25 = arith.mulf %21, %24 : vector<16x128xf32>
    %26 = math.erf %25 : vector<16x128xf32>
    %cst_12 = arith.constant 1.000000e+00 : f32
    %27 = vector.broadcast %cst_12 : f32 to vector<16x128xf32>
    %28 = arith.addf %27, %26 : vector<16x128xf32>
    %29 = arith.mulf %23, %28 : vector<16x128xf32>
    %c0_13 = arith.constant 0 : index
    %c0_14 = arith.constant 0 : index
    %30 = vector.load %arg4[%c0_13, %c0_14] : memref<128x128xf32, #tpu.memory_space<vmem>>, vector<128x128xf32>
    %cst_15 = arith.constant dense<0.000000e+00> : vector<16x128xf32>
    %31 = tpu.matmul %29, %30, %cst_15 {dimension_numbers = #tpu.dot_dimension_numbers<[1], [0], [0], [1], [0, 0, 1, 1], [], []>} : vector<16x128xf32>, vector<128x128xf32>, vector<16x128xf32> -> vector<16x128xf32>
    %c0_16 = arith.constant 0 : index
    %c0_17 = arith.constant 0 : index
    %32 = vector.load %arg5[%c0_16, %c0_17] : memref<1x128xf32, #tpu.memory_space<vmem>>, vector<1x128xf32>
    %33 = vector.broadcast %32 : vector<1x128xf32> to vector<16x128xf32>
    %34 = arith.addf %31, %33 : vector<16x128xf32>
    %c0_18 = arith.constant 0 : index
    %c0_19 = arith.constant 0 : index
    %35 = vector.load %arg6[%c0_18, %c0_19] : memref<16x128xf32, #tpu.memory_space<vmem>>, vector<16x128xf32>
    tpu.vector_store %arg6[%c0_18, %c0_19], %34 {strides = array<i32>} : memref<16x128xf32, #tpu.memory_space<vmem>>, vector<16x128xf32>,
    return
  }
  func.func @transform_0(%arg0: i32) -> (i32, i32) {
    %c0_i32 = arith.constant 0 : i32
    %c0_i32_0 = arith.constant 0 : i32
    return %arg0, %c0_i32 : i32, i32
  }
  func.func @transform_1(%arg0: i32) -> (i32, i32) {
    %c0_i32 = arith.constant 0 : i32
    %c0_i32_0 = arith.constant 0 : i32
    %c0_i32_1 = arith.constant 0 : i32
    return %c0_i32, %c0_i32_0 : i32, i32
  }
  func.func @transform_2(%arg0: i32) -> (i32, i32) {
    %c0_i32 = arith.constant 0 : i32
    %c0_i32_0 = arith.constant 0 : i32
    %c0_i32_1 = arith.constant 0 : i32
    return %c0_i32, %c0_i32_0 : i32, i32
  }
  func.func @transform_3(%arg0: i32) -> (i32, i32) {
    %c0_i32 = arith.constant 0 : i32
    %c0_i32_0 = arith.constant 0 : i32
    %c0_i32_1 = arith.constant 0 : i32
    return %c0_i32, %c0_i32_0 : i32, i32
  }
  func.func @transform_4(%arg0: i32) -> (i32, i32) {
    %c0_i32 = arith.constant 0 : i32
    %c0_i32_0 = arith.constant 0 : i32
    %c0_i32_1 = arith.constant 0 : i32
    return %c0_i32, %c0_i32_0 : i32, i32
  }
  func.func @transform_5(%arg0: i32) -> (i32, i32) {
    %c0_i32 = arith.constant 0 : i32
    %c0_i32_0 = arith.constant 0 : i32
    return %arg0, %c0_i32 : i32, i32
  }
}

module attributes {stable_mosaic.version = 11 : i64} {
  func.func @_prediction_head_kernel(%arg0: i32, %arg1: memref<16x32xf32, #tpu.memory_space<vmem>>, %arg2: memref<32x128xf32, #tpu.memory_space<vmem>>, %arg3: memref<1x128xf32, #tpu.memory_space<vmem>>, %arg4: memref<128x128xf32, #tpu.memory_space<vmem>>, %arg5: memref<1x128xf32, #tpu.memory_space<vmem>>, %arg6: memref<16x128xf32, #tpu.memory_space<vmem>>) attributes {dimension_semantics = [#tpu.dimension_semantics<parallel>], iteration_bounds = array<i64: 1>, scalar_prefetch = 0 : i64, scratch_operands = 0 : i64, tpu.core_type = #tpu.core_type<tc>, window_params = [{transform_indices = @transform_0, window_bounds = array<i64: 16, 32>}, {pipeline_mode = #tpu.pipeline_mode<synchronous>, transform_indices = @transform_1, window_bounds = array<i64: 32, 128>}, {pipeline_mode = #tpu.pipeline_mode<synchronous>, transform_indices = @transform_2, window_bounds = array<i64: 1, 128>}, {pipeline_mode = #tpu.pipeline_mode<synchronous>, transform_indices = @transform_3, window_bounds = array<i64: 128, 128>}, {pipeline_mode = #tpu.pipeline_mode<synchronous>, transform_indices = @transform_4, window_bounds = array<i64: 1, 128>}, {transform_indices = @transform_5, window_bounds = array<i64: 16, 128>}]} {
    %c0 = arith.constant 0 : index
    %c0_0 = arith.constant 0 : index
    %0 = vector.load %arg1[%c0, %c0_0] : memref<16x32xf32, #tpu.memory_space<vmem>>, vector<16x32xf32>
    %cst = arith.constant dense<0.000000e+00> : vector<16xf32>
    %1 = vector.multi_reduction <add>, %0, %cst [1] : vector<16x32xf32> to vector<16xf32>
    %2 = vector.shape_cast %1 : vector<16xf32> to vector<16x1xf32>
    %cst_1 = arith.constant 3.200000e+01 : f32
    %3 = vector.broadcast %cst_1 : f32 to vector<16x1xf32>
    %4 = arith.divf %2, %3 : vector<16x1xf32>
    %5 = vector.broadcast %4 : vector<16x1xf32> to vector<16x32xf32>
    %6 = arith.subf %0, %5 : vector<16x32xf32>
    %7 = arith.mulf %6, %6 : vector<16x32xf32>
    %cst_2 = arith.constant dense<0.000000e+00> : vector<16xf32>
    %8 = vector.multi_reduction <add>, %7, %cst_2 [1] : vector<16x32xf32> to vector<16xf32>
    %9 = vector.shape_cast %8 : vector<16xf32> to vector<16x1xf32>
    %cst_3 = arith.constant 3.200000e+01 : f32
    %10 = vector.broadcast %cst_3 : f32 to vector<16x1xf32>
    %11 = arith.divf %9, %10 : vector<16x1xf32>
    %cst_4 = arith.constant 9.99999974E-6 : f32
    %12 = vector.broadcast %cst_4 : f32 to vector<16x1xf32>
    %13 = arith.addf %11, %12 : vector<16x1xf32>
    %14 = math.rsqrt %13 : vector<16x1xf32>
    %15 = vector.broadcast %14 : vector<16x1xf32> to vector<16x32xf32>
    %16 = arith.mulf %6, %15 : vector<16x32xf32>
    %c0_5 = arith.constant 0 : index
    %c0_6 = arith.constant 0 : index
    %17 = vector.load %arg2[%c0_5, %c0_6] : memref<32x128xf32, #tpu.memory_space<vmem>>, vector<32x128xf32>
    %cst_7 = arith.constant dense<0.000000e+00> : vector<16x128xf32>
    %18 = tpu.matmul %16, %17, %cst_7 {dimension_numbers = #tpu.dot_dimension_numbers<[1], [0], [0], [1], [0, 0, 1, 1], [], []>} : vector<16x32xf32>, vector<32x128xf32>, vector<16x128xf32> -> vector<16x128xf32>
    %c0_8 = arith.constant 0 : index
    %c0_9 = arith.constant 0 : index
    %19 = vector.load %arg3[%c0_8, %c0_9] : memref<1x128xf32, #tpu.memory_space<vmem>>, vector<1x128xf32>
    %20 = vector.broadcast %19 : vector<1x128xf32> to vector<16x128xf32>
    %21 = arith.addf %18, %20 : vector<16x128xf32>
    %cst_10 = arith.constant 5.000000e-01 : f32
    %22 = vector.broadcast %cst_10 : f32 to vector<16x128xf32>
    %23 = arith.mulf %22, %21 : vector<16x128xf32>
    %cst_11 = arith.constant 0.707106769 : f32
    %24 = vector.broadcast %cst_11 : f32 to vector<16x128xf32>
    %25 = arith.mulf %21, %24 : vector<16x128xf32>
    %26 = math.erf %25 : vector<16x128xf32>
    %cst_12 = arith.constant 1.000000e+00 : f32
    %27 = vector.broadcast %cst_12 : f32 to vector<16x128xf32>
    %28 = arith.addf %27, %26 : vector<16x128xf32>
    %29 = arith.mulf %23, %28 : vector<16x128xf32>
    %c0_13 = arith.constant 0 : index
    %c0_14 = arith.constant 0 : index
    %30 = vector.load %arg4[%c0_13, %c0_14] : memref<128x128xf32, #tpu.memory_space<vmem>>, vector<128x128xf32>
    %cst_15 = arith.constant dense<0.000000e+00> : vector<16x128xf32>
    %31 = tpu.matmul %29, %30, %cst_15 {dimension_numbers = #tpu.dot_dimension_numbers<[1], [0], [0], [1], [0, 0, 1, 1], [], []>} : vector<16x128xf32>, vector<128x128xf32>, vector<16x128xf32> -> vector<16x128xf32>
    %c0_16 = arith.constant 0 : index
    %c0_17 = arith.constant 0 : index
    %32 = vector.load %arg5[%c0_16, %c0_17] : memref<1x128xf32, #tpu.memory_space<vmem>>, vector<1x128xf32>
    %33 = vector.broadcast %32 : vector<1x128xf32> to vector<16x128xf32>
    %34 = arith.addf %31, %33 : vector<16x128xf32>
    %c0_18 = arith.constant 0 : index
    %c0_19 = arith.constant 0 : index
    %35 = vector.load %arg6[%c0_18, %c0_19] : memref<16x128xf32, #tpu.memory_space<vmem>>, vector<16x128xf32>
    tpu.vector_store %arg6[%c0_18, %c0_19], %34 {strides = array<i32>} : memref<16x128xf32, #tpu.memory_space<vmem>>, vector<16x128xf32>,
    return
  }
  func.func @transform_0(%arg0: i32) -> (i32, i32) {
    %c0_i32 = arith.constant 0 : i32
    %c0_i32_0 = arith.constant 0 : i32
    return %arg0, %c0_i32 : i32, i32
  }
  func.func @transform_1(%arg0: i32) -> (i32, i32) {
    %c0_i32 = arith.constant 0 : i32
    %c0_i32_0 = arith.constant 0 : i32
    %c0_i32_1 = arith.constant 0 : i32
    return %c0_i32, %c0_i32_0 : i32, i32
  }
  func.func @transform_2(%arg0: i32) -> (i32, i32) {
    %c0_i32 = arith.constant 0 : i32
    %c0_i32_0 = arith.constant 0 : i32
    %c0_i32_1 = arith.constant 0 : i32
    return %c0_i32, %c0_i32_0 : i32, i32
  }
  func.func @transform_3(%arg0: i32) -> (i32, i32) {
    %c0_i32 = arith.constant 0 : i32
    %c0_i32_0 = arith.constant 0 : i32
    %c0_i32_1 = arith.constant 0 : i32
    return %c0_i32, %c0_i32_0 : i32, i32
  }
  func.func @transform_4(%arg0: i32) -> (i32, i32) {
    %c0_i32 = arith.constant 0 : i32
    %c0_i32_0 = arith.constant 0 : i32
    %c0_i32_1 = arith.constant 0 : i32
    return %c0_i32, %c0_i32_0 : i32, i32
  }
  func.func @transform_5(%arg0: i32) -> (i32, i32) {
    %c0_i32 = arith.constant 0 : i32
    %c0_i32_0 = arith.constant 0 : i32
    return %arg0, %c0_i32 : i32, i32
  }
}

</mosaic_0001>

<bundles_post_ra>
// kernel: tpu_custom_call.1
= control target key start
LH: loop header
LB: loop body
LE: loop exit
PB: predicated region body
PF: predicated region fallthrough
CT: control target
= control target key end

     0   :  { %10 = vsyncpa [#allocation3], 0  ;;  %s558_s0 = inlined_call_operand.hbm [shape: f32[16,32], index: 0, kind: input, shape index: {}]   ;;  %s559_s1 = inlined_call_operand.hbm [shape: f32[32,128], index: 1, kind: input, shape index: {}]   ;;  %s560_s2 = inlined_call_operand.vmem [shape: f32[1,128], index: 2, kind: input, shape index: {}]   ;;  %s561_s3 = inlined_call_operand.hbm [shape: f32[128,128], index: 3, kind: input, shape index: {}]   ;;  %s562_s4 = inlined_call_operand.vmem [shape: f32[1,128], index: 4, kind: input, shape index: {}]   ;;  %s563_s5 = inlined_call_operand.hbm [shape: f32[16,128], index: 5, kind: output, shape index: {}]  }
   0x1   :  { %11 = vsyncpa [#allocation6], 0 }
   0x2   :  { %12 = vsyncpa [#allocation4], 0  ;;  %s486_s18 = smov [#allocation5]   ;;  %s487_s20 = smov [#allocation2]  }
   0x3   :  { %s30_s19 = sshll.u32 %s486_s18, 4  ;;  %s18_s21 = sshll.u32 %s487_s20, 4  ;;  %s31_s19 = int_to_ptr.vmem [resolvable:$true] %s30_s19  ;;  %s19_s21 = int_to_ptr.vmem [resolvable:$true] %s18_s21 }
   0x4   :  { %s408_s22 = scalar_lea.vmem %s31_s19, 512  ;;  %p413_p1 = scmp.lt.s32.totalorder %s31_s19, %s31_s19 }
   0x5   :  { %p409_p0 = scmp.ne.s32.totalorder %s31_s19, %s408_s22  ;;  %p414_p2 = scmp.lt.s32.totalorder %s408_s22, %s408_s22 }
   0x7   :  { %p415_p3 = por %p414_p2, %p413_p1 }
   0x9   :  { %p416_p4 = pnand %p415_p3, %p409_p0 }
   0xb   :  { %419 = shalt.err (!%p416_p4)
}
   0xc   :  { %s488_s23 = smov 128   ;;  %s489_s24 = smov 8  }
   0xd   :  { %36 = dma.hbm_to_vmem [thread:$0]  %s559_s1, 512, %s31_s19, [#allocation6], %s488_s23, %s488_s23, %s489_s24  }
   0xe   :  { %s428_s27 = scalar_lea.vmem %s19_s21, 256  ;;  %p433_p6 = scmp.lt.s32.totalorder %s19_s21, %s19_s21 }
   0xf   :  { %p429_p5 = scmp.ne.s32.totalorder %s19_s21, %s428_s27  ;;  %p434_p7 = scmp.lt.s32.totalorder %s428_s27, %s428_s27 }
  0x11   :  { %p435_p8 = por %p434_p7, %p433_p6 }
  0x13   :  { %p436_p9 = pnand %p435_p8, %p429_p5 }
  0x15   :  { %439 = shalt.err (!%p436_p9)
}
  0x16   :  { %24 = dma.hbm_to_vmem [thread:$0]  %s558_s0, 256, %s19_s21, [#allocation3], %s488_s23, %s488_s23, %s489_s24  }
  0x17   :  { %s490_s30 = smov [#allocation7]  }
  0x18   :  { %s44_s6 = sshll.u32 %s490_s30, 4  ;;  %s45_s6 = int_to_ptr.vmem [resolvable:$true] %s44_s6 }
  0x19   :  { %s448_s7 = scalar_lea.vmem %s45_s6, 2048  ;;  %p453_p11 = scmp.lt.s32.totalorder %s45_s6, %s45_s6 }
  0x1a   :  { %p449_p10 = scmp.ne.s32.totalorder %s45_s6, %s448_s7  ;;  %p454_p12 = scmp.lt.s32.totalorder %s448_s7, %s448_s7 }
  0x1c   :  { %p455_p13 = por %p454_p12, %p453_p11 }
  0x1e   :  { %p456_p0 = pnand %p455_p13, %p449_p10 }
  0x20   :  { %459 = shalt.err (!%p456_p0)
}
  0x21   :  { %50 = dma.hbm_to_vmem [thread:$0]  %s561_s3, 2048, %s45_s6, [#allocation6], %s488_s23, %s488_s23, %s489_s24  }
  0x22   :  { %480 = dma.done.wait [#allocation3], 256  }
  0x23   :  { %481 = vsyncadd [#allocation3], 4294967040 }
  0x24   :  { %482 = dma.done.wait [#allocation6], 2560  }
  0x25   :  { %483 = vsyncadd [#allocation6], 4294964736  ;;  %vm64_vm0 = vcmask 261120   ;;  %v62_v0 = vld [vmem:[#allocation2] sm:$0xff]  ;;  %v63_v1 = vld [vmem:[#allocation2 + $0x8] sm:$0xff]  ;;  %s491_s10 = smov [#allocation8]  }
  0x26   :  { %v65_v2 = vsel %vm64_vm0, %v62_v0, 0.0  ;;  %v68_v3 = vsel %vm64_vm0, %v63_v1, 0.0  ;;  %v95_v14 = vld [vmem:[#allocation5 + $0x18] sm:$0xff]  ;;  %v94_v15 = vld [vmem:[#allocation5 + $0x10] sm:$0xff]  ;;  %v93_v16 = vld [vmem:[#allocation5 + $0x8] sm:$0xff]  ;;  %s299_s11 = sshll.u32 %s491_s10, 4  ;;  %s300_s11 = int_to_ptr.vmem [resolvable:$true] %s299_s11 }
  0x27   :  { %66 = vadd.xlane.f32.xlu0 %v65_v2  ;;  %340 = vmatprep.subr.mxu0 %v95_v14  ;;  %v92_v17 = vld [vmem:[#allocation5] sm:$0xff]  ;;  %v209_v18 = vld [vmem:[#allocation7 + $0x78] sm:$0xff]  ;;  %v208_v19 = vld [vmem:[#allocation7 + $0x70] sm:$0xff]  ;;  %s460_s12 = scalar_lea.vmem %s300_s11, 256  ;;  %p465_p2 = scmp.lt.s32.totalorder %s300_s11, %s300_s11 }
  0x28   :  { %341 = vmatpush3.msra.mxu0 %v95_v14  ;;  %351 = vmatprep.subr.mxu1 %v209_v18  ;;  %v207_v20 = vld [vmem:[#allocation7 + $0x68] sm:$0xff]  ;;  %v206_v31 = vld [vmem:[#allocation7 + $0x60] sm:$0xff]  ;;  %v205_v32 = vld [vmem:[#allocation7 + $0x58] sm:$0xff]  ;;  %p461_p1 = scmp.ne.s32.totalorder %s300_s11, %s460_s12  ;;  %p466_p3 = scmp.lt.s32.totalorder %s460_s12, %s460_s12 }
  0x29   :  { %342 = vmatprep.subr.mxu0 %v94_v15  ;;  %352 = vmatpush3.msra.mxu1 %v209_v18  ;;  %v204_v33 = vld [vmem:[#allocation7 + $0x50] sm:$0xff]  ;;  %v203_v34 = vld [vmem:[#allocation7 + $0x48] sm:$0xff]  ;;  %v202_v35 = vld [vmem:[#allocation7 + $0x40] sm:$0xff] }
  0x2a   :  { %343 = vmatpush3.msra.mxu0 %v94_v15  ;;  %353 = vmatprep.subr.mxu1 %v208_v19  ;;  %v201_v36 = vld [vmem:[#allocation7 + $0x38] sm:$0xff]  ;;  %v200_v37 = vld [vmem:[#allocation7 + $0x30] sm:$0xff]  ;;  %v199_v38 = vld [vmem:[#allocation7 + $0x28] sm:$0xff]  ;;  %p467_p4 = por %p466_p3, %p465_p2 }
  0x2b   :  { %69 = vadd.xlane.f32.xlu0 %v68_v3  ;;  %344 = vmatprep.subr.mxu0 %v93_v16  ;;  %v198_v39 = vld [vmem:[#allocation7 + $0x20] sm:$0xff]  ;;  %v197_v40 = vld [vmem:[#allocation7 + $0x18] sm:$0xff]  ;;  %v196_v41 = vld [vmem:[#allocation7 + $0x10] sm:$0xff] }
  0x2c   :  { %345 = vmatpush3.msra.mxu0 %v93_v16  ;;  %354 = vmatpush3.msra.mxu1 %v208_v19  ;;  %v195_v42 = vld [vmem:[#allocation7 + $0x8] sm:$0xff]  ;;  %v194_v43 = vld [vmem:[#allocation7] sm:$0xff]  ;;  %v312_v44 = vld [vmem:[%s560_s2] ss:$0 sm:$0xff]  ;;  %p468_p5 = pnand %p467_p4, %p461_p1 }
  0x2d   :  { %346 = vmatprep.subr.mxu0 %v92_v17  ;;  %355 = vmatprep.subr.mxu1 %v207_v20  ;;  %v315_v59 = vld [vmem:[%s562_s4] ss:$0 sm:$0xff] }
  0x2e   :  { %347 = vmatpush3.msra.mxu0 %v92_v17  ;;  %356 = vmatpush3.msra.mxu1 %v207_v20 }
  0x2f   :  { %357 = vmatprep.subr.mxu1 %v206_v31 }
  0x30   :  { %358 = vmatpush3.msra.mxu1 %v206_v31 }
  0x31   :  { %359 = vmatprep.subr.mxu1 %v205_v32 }
  0x32   :  { %360 = vmatpush3.msra.mxu1 %v205_v32 }
  0x33   :  { %361 = vmatprep.subr.mxu1 %v204_v33 }
  0x34   :  { %362 = vmatpush3.msra.mxu1 %v204_v33 }
  0x35   :  { %363 = vmatprep.subr.mxu1 %v203_v34 }
  0x36   :  { %364 = vmatpush3.msra.mxu1 %v203_v34 }
  0x37   :  { %365 = vmatprep.subr.mxu1 %v202_v35 }
  0x38   :  { %366 = vmatpush3.msra.mxu1 %v202_v35 }
  0x39   :  { %367 = vmatprep.subr.mxu1 %v201_v36 }
  0x3a   :  { %368 = vmatpush3.msra.mxu1 %v201_v36 }
  0x3b   :  { %369 = vmatprep.subr.mxu1 %v200_v37 }
  0x3c   :  { %370 = vmatpush3.msra.mxu1 %v200_v37 }
  0x3d   :  { %371 = vmatprep.subr.mxu1 %v199_v38 }
  0x3e   :  { %372 = vmatpush3.msra.mxu1 %v199_v38 }
  0x3f   :  { %373 = vmatprep.subr.mxu1 %v198_v39 }
  0x40   :  { %374 = vmatpush3.msra.mxu1 %v198_v39 }
  0x41   :  { %375 = vmatprep.subr.mxu1 %v197_v40 }
  0x42   :  { %376 = vmatpush3.msra.mxu1 %v197_v40 }
  0x43   :  { %377 = vmatprep.subr.mxu1 %v196_v41 }
  0x44   :  { %378 = vmatpush3.msra.mxu1 %v196_v41 }
  0x45   :  { %379 = vmatprep.subr.mxu1 %v195_v42 }
  0x46   :  { %380 = vmatpush3.msra.mxu1 %v195_v42 }
  0x47   :  { %381 = vmatprep.subr.mxu1 %v194_v43 }
  0x48   :  { %382 = vmatpush3.msra.mxu1 %v194_v43 }
  0xb0   :  { %v67_v4 = vpop.xlane.xlu0 %66 }
  0xb1   :  { %v72_v5 = vmul.f32 0.03125, %v67_v4 }
  0xb3   :  { %v74_v6 = vsub.f32 %v62_v0, %v72_v5 }
  0xb4   :  { %v70_v7 = vpop.xlane.xlu0 %69 }
  0xb5   :  { %v73_v8 = vmul.f32 0.03125, %v70_v7  ;;  %v76_v9 = vmul.f32 %v74_v6, %v74_v6 }
  0xb7   :  { %v75_v10 = vsub.f32 %v63_v1, %v73_v8  ;;  %v78_v11 = vsel %vm64_vm0, %v76_v9, 0.0 }
  0xb8   :  { %79 = vadd.xlane.f32.xlu1 %v78_v11 }
  0xb9   :  { %v77_v12 = vmul.f32 %v75_v10, %v75_v10 }
  0xbb   :  { %v81_v13 = vsel %vm64_vm0, %v77_v12, 0.0 }
  0xbc   :  { %82 = vadd.xlane.f32.xlu1 %v81_v13 }
 0x141   :  { %v80_v21 = vpop.xlane.xlu1 %79 }
 0x142   :  { %v84_v22 = vmul.f32 0.03125, %v80_v21 }
 0x144   :  { %v86_v23 = vadd.f32 1e-05, %v84_v22 }
 0x145   :  { %v83_v24 = vpop.xlane.xlu1 %82 }
 0x146   :  { %392 = vrsqrt.f32 %v86_v23  ;;  %v85_v25 = vmul.f32 0.03125, %v83_v24 }
 0x148   :  { %v87_v26 = vadd.f32 1e-05, %v85_v25 }
 0x14a   :  { %394 = vrsqrt.f32 %v87_v26 }
 0x153   :  { %v393_v27 = vpop.eup %392 }
 0x154   :  { %v90_v28 = vmul.f32 %v393_v27, %v74_v6 }
 0x156   :  { %348 = vmatprep.mubr.msk.f32.mxu0 %vm64_vm0, %v90_v28 }
 0x157   :  { %v395_v29 = vpop.eup %394 }
 0x158   :  { %v91_v30 = vmul.f32 %v395_v29, %v75_v10 }
 0x15a   :  { %349 = vmatmul.mubr.msk.f32.vlgmr.msra.gmra.mxu0 %vm64_vm0, %v91_v30 }
 0x21a   :  { %v350_v45 = vpop.f32.mrf.mxu0 }
 0x21b   :  { %v181_v46 = vadd.f32 %v350_v45, %v312_v44 }
 0x21c   :  { %v175_v47 = vpop.f32.mrf.mxu0 }
 0x21d   :  { %v187_v48 = vmul.f32 0.70710677, %v181_v46  ;;  %v176_v49 = vadd.f32 %v312_v44, %v175_v47  ;;  %v185_v56 = vmul.f32 0.5, %v181_v46 }
 0x21f   :  { %396 = verf.f32 %v187_v48  ;;  %v186_v50 = vmul.f32 0.70710677, %v176_v49  ;;  %v184_v54 = vmul.f32 0.5, %v176_v49 }
 0x221   :  { %398 = verf.f32 %v186_v50 }
 0x22c   :  { %v397_v51 = vpop.eup %396 }
 0x22d   :  { %v191_v53 = vadd.f32 1.0, %v397_v51 }
 0x22e   :  { %v399_v52 = vpop.eup %398 }
 0x22f   :  { %v190_v55 = vadd.f32 1.0, %v399_v52  ;;  %v193_v58 = vmul.f32 %v191_v53, %v185_v56 }
 0x231   :  { %v192_v57 = vmul.f32 %v190_v55, %v184_v54 }
 0x233   :  { %383 = vmatprep.mubr.f32.mxu1 %v192_v57 }
 0x234   :  { %384 = vmatmul.mubr.f32.vlgmr.msra.gmra.mxu1 %v193_v58 }
 0x2f4   :  { %v385_v60 = vpop.f32.mrf.mxu1 }
 0x2f5   :  { %v289_v61 = vadd.f32 %v385_v60, %v315_v59 }
 0x2f6   :  { %v283_v62 = vpop.f32.mrf.mxu1 }
 0x2f7   :  { %293 = vst [vmem:[#allocation8 + $0x8] sm:$0xff] %v289_v61  ;;  %v284_v63 = vadd.f32 %v315_v59, %v283_v62 }
 0x2f9   :  { %292 = vst [vmem:[#allocation8] sm:$0xff] %v284_v63 }
 0x2fa   :  { %471 = shalt.err (!%p468_p5)
}
 0x2fb   :  { %305 = dma.vmem_to_hbm [thread:$0]  %s300_s11, 256, %s563_s5, [#allocation4], %s488_s23, %s488_s23, %s489_s24  }
 0x2fc   :  { %484 = dma.done.wait [#allocation4], 256  }
 0x2fd   :  { %485 = vsyncadd [#allocation4], 4294967040 }
 0x2fe   :  { %309 = vsyncpa [#allocation3], 1 }
 0x2ff   :  { %310 = vsyncpa [#allocation6], 1 }
 0x300   :  { %311 = vsyncpa [#allocation4], 1 }

// kernel: tpu_custom_call.1
= control target key start
LH: loop header
LB: loop body
LE: loop exit
PB: predicated region body
PF: predicated region fallthrough
CT: control target
= control target key end

     0   :  { %10 = vsyncpa [#allocation3], 0  ;;  %s558_s0 = inlined_call_operand.hbm [shape: f32[16,32], index: 0, kind: input, shape index: {}]   ;;  %s559_s1 = inlined_call_operand.hbm [shape: f32[32,128], index: 1, kind: input, shape index: {}]   ;;  %s560_s2 = inlined_call_operand.vmem [shape: f32[1,128], index: 2, kind: input, shape index: {}]   ;;  %s561_s3 = inlined_call_operand.hbm [shape: f32[128,128], index: 3, kind: input, shape index: {}]   ;;  %s562_s4 = inlined_call_operand.vmem [shape: f32[1,128], index: 4, kind: input, shape index: {}]   ;;  %s563_s5 = inlined_call_operand.hbm [shape: f32[16,128], index: 5, kind: output, shape index: {}]  }
   0x1   :  { %11 = vsyncpa [#allocation6], 0 }
   0x2   :  { %12 = vsyncpa [#allocation4], 0  ;;  %s486_s18 = smov [#allocation5]   ;;  %s487_s20 = smov [#allocation2]  }
   0x3   :  { %s30_s19 = sshll.u32 %s486_s18, 4  ;;  %s18_s21 = sshll.u32 %s487_s20, 4  ;;  %s31_s19 = int_to_ptr.vmem [resolvable:$true] %s30_s19  ;;  %s19_s21 = int_to_ptr.vmem [resolvable:$true] %s18_s21 }
   0x4   :  { %s408_s22 = scalar_lea.vmem %s31_s19, 512  ;;  %p413_p1 = scmp.lt.s32.totalorder %s31_s19, %s31_s19 }
   0x5   :  { %p409_p0 = scmp.ne.s32.totalorder %s31_s19, %s408_s22  ;;  %p414_p2 = scmp.lt.s32.totalorder %s408_s22, %s408_s22 }
   0x7   :  { %p415_p3 = por %p414_p2, %p413_p1 }
   0x9   :  { %p416_p4 = pnand %p415_p3, %p409_p0 }
   0xb   :  { %419 = shalt.err (!%p416_p4)
}
   0xc   :  { %s488_s23 = smov 128   ;;  %s489_s24 = smov 8  }
   0xd   :  { %36 = dma.hbm_to_vmem [thread:$0]  %s559_s1, 512, %s31_s19, [#allocation6], %s488_s23, %s488_s23, %s489_s24  }
   0xe   :  { %s428_s27 = scalar_lea.vmem %s19_s21, 256  ;;  %p433_p6 = scmp.lt.s32.totalorder %s19_s21, %s19_s21 }
   0xf   :  { %p429_p5 = scmp.ne.s32.totalorder %s19_s21, %s428_s27  ;;  %p434_p7 = scmp.lt.s32.totalorder %s428_s27, %s428_s27 }
  0x11   :  { %p435_p8 = por %p434_p7, %p433_p6 }
  0x13   :  { %p436_p9 = pnand %p435_p8, %p429_p5 }
  0x15   :  { %439 = shalt.err (!%p436_p9)
}
  0x16   :  { %24 = dma.hbm_to_vmem [thread:$0]  %s558_s0, 256, %s19_s21, [#allocation3], %s488_s23, %s488_s23, %s489_s24  }
  0x17   :  { %s490_s30 = smov [#allocation7]  }
  0x18   :  { %s44_s6 = sshll.u32 %s490_s30, 4  ;;  %s45_s6 = int_to_ptr.vmem [resolvable:$true] %s44_s6 }
  0x19   :  { %s448_s7 = scalar_lea.vmem %s45_s6, 2048  ;;  %p453_p11 = scmp.lt.s32.totalorder %s45_s6, %s45_s6 }
  0x1a   :  { %p449_p10 = scmp.ne.s32.totalorder %s45_s6, %s448_s7  ;;  %p454_p12 = scmp.lt.s32.totalorder %s448_s7, %s448_s7 }
  0x1c   :  { %p455_p13 = por %p454_p12, %p453_p11 }
  0x1e   :  { %p456_p0 = pnand %p455_p13, %p449_p10 }
  0x20   :  { %459 = shalt.err (!%p456_p0)
}
  0x21   :  { %50 = dma.hbm_to_vmem [thread:$0]  %s561_s3, 2048, %s45_s6, [#allocation6], %s488_s23, %s488_s23, %s489_s24  }
  0x22   :  { %480 = dma.done.wait [#allocation3], 256  }
  0x23   :  { %481 = vsyncadd [#allocation3], 4294967040 }
  0x24   :  { %482 = dma.done.wait [#allocation6], 2560  }
  0x25   :  { %483 = vsyncadd [#allocation6], 4294964736  ;;  %vm64_vm0 = vcmask 261120   ;;  %v62_v0 = vld [vmem:[#allocation2] sm:$0xff]  ;;  %v63_v1 = vld [vmem:[#allocation2 + $0x8] sm:$0xff]  ;;  %s491_s10 = smov [#allocation8]  }
  0x26   :  { %v65_v2 = vsel %vm64_vm0, %v62_v0, 0.0  ;;  %v68_v3 = vsel %vm64_vm0, %v63_v1, 0.0  ;;  %v95_v14 = vld [vmem:[#allocation5 + $0x18] sm:$0xff]  ;;  %v94_v15 = vld [vmem:[#allocation5 + $0x10] sm:$0xff]  ;;  %v93_v16 = vld [vmem:[#allocation5 + $0x8] sm:$0xff]  ;;  %s299_s11 = sshll.u32 %s491_s10, 4  ;;  %s300_s11 = int_to_ptr.vmem [resolvable:$true] %s299_s11 }
  0x27   :  { %66 = vadd.xlane.f32.xlu0 %v65_v2  ;;  %340 = vmatprep.subr.mxu0 %v95_v14  ;;  %v92_v17 = vld [vmem:[#allocation5] sm:$0xff]  ;;  %v209_v18 = vld [vmem:[#allocation7 + $0x78] sm:$0xff]  ;;  %v208_v19 = vld [vmem:[#allocation7 + $0x70] sm:$0xff]  ;;  %s460_s12 = scalar_lea.vmem %s300_s11, 256  ;;  %p465_p2 = scmp.lt.s32.totalorder %s300_s11, %s300_s11 }
  0x28   :  { %341 = vmatpush3.msra.mxu0 %v95_v14  ;;  %351 = vmatprep.subr.mxu1 %v209_v18  ;;  %v207_v20 = vld [vmem:[#allocation7 + $0x68] sm:$0xff]  ;;  %v206_v31 = vld [vmem:[#allocation7 + $0x60] sm:$0xff]  ;;  %v205_v32 = vld [vmem:[#allocation7 + $0x58] sm:$0xff]  ;;  %p461_p1 = scmp.ne.s32.totalorder %s300_s11, %s460_s12  ;;  %p466_p3 = scmp.lt.s32.totalorder %s460_s12, %s460_s12 }
  0x29   :  { %342 = vmatprep.subr.mxu0 %v94_v15  ;;  %352 = vmatpush3.msra.mxu1 %v209_v18  ;;  %v204_v33 = vld [vmem:[#allocation7 + $0x50] sm:$0xff]  ;;  %v203_v34 = vld [vmem:[#allocation7 + $0x48] sm:$0xff]  ;;  %v202_v35 = vld [vmem:[#allocation7 + $0x40] sm:$0xff] }
  0x2a   :  { %343 = vmatpush3.msra.mxu0 %v94_v15  ;;  %353 = vmatprep.subr.mxu1 %v208_v19  ;;  %v201_v36 = vld [vmem:[#allocation7 + $0x38] sm:$0xff]  ;;  %v200_v37 = vld [vmem:[#allocation7 + $0x30] sm:$0xff]  ;;  %v199_v38 = vld [vmem:[#allocation7 + $0x28] sm:$0xff]  ;;  %p467_p4 = por %p466_p3, %p465_p2 }
  0x2b   :  { %69 = vadd.xlane.f32.xlu0 %v68_v3  ;;  %344 = vmatprep.subr.mxu0 %v93_v16  ;;  %v198_v39 = vld [vmem:[#allocation7 + $0x20] sm:$0xff]  ;;  %v197_v40 = vld [vmem:[#allocation7 + $0x18] sm:$0xff]  ;;  %v196_v41 = vld [vmem:[#allocation7 + $0x10] sm:$0xff] }
  0x2c   :  { %345 = vmatpush3.msra.mxu0 %v93_v16  ;;  %354 = vmatpush3.msra.mxu1 %v208_v19  ;;  %v195_v42 = vld [vmem:[#allocation7 + $0x8] sm:$0xff]  ;;  %v194_v43 = vld [vmem:[#allocation7] sm:$0xff]  ;;  %v312_v44 = vld [vmem:[%s560_s2] ss:$0 sm:$0xff]  ;;  %p468_p5 = pnand %p467_p4, %p461_p1 }
  0x2d   :  { %346 = vmatprep.subr.mxu0 %v92_v17  ;;  %355 = vmatprep.subr.mxu1 %v207_v20  ;;  %v315_v59 = vld [vmem:[%s562_s4] ss:$0 sm:$0xff] }
  0x2e   :  { %347 = vmatpush3.msra.mxu0 %v92_v17  ;;  %356 = vmatpush3.msra.mxu1 %v207_v20 }
  0x2f   :  { %357 = vmatprep.subr.mxu1 %v206_v31 }
  0x30   :  { %358 = vmatpush3.msra.mxu1 %v206_v31 }
  0x31   :  { %359 = vmatprep.subr.mxu1 %v205_v32 }
  0x32   :  { %360 = vmatpush3.msra.mxu1 %v205_v32 }
  0x33   :  { %361 = vmatprep.subr.mxu1 %v204_v33 }
  0x34   :  { %362 = vmatpush3.msra.mxu1 %v204_v33 }
  0x35   :  { %363 = vmatprep.subr.mxu1 %v203_v34 }
  0x36   :  { %364 = vmatpush3.msra.mxu1 %v203_v34 }
  0x37   :  { %365 = vmatprep.subr.mxu1 %v202_v35 }
  0x38   :  { %366 = vmatpush3.msra.mxu1 %v202_v35 }
  0x39   :  { %367 = vmatprep.subr.mxu1 %v201_v36 }
  0x3a   :  { %368 = vmatpush3.msra.mxu1 %v201_v36 }
  0x3b   :  { %369 = vmatprep.subr.mxu1 %v200_v37 }
  0x3c   :  { %370 = vmatpush3.msra.mxu1 %v200_v37 }
  0x3d   :  { %371 = vmatprep.subr.mxu1 %v199_v38 }
  0x3e   :  { %372 = vmatpush3.msra.mxu1 %v199_v38 }
  0x3f   :  { %373 = vmatprep.subr.mxu1 %v198_v39 }
  0x40   :  { %374 = vmatpush3.msra.mxu1 %v198_v39 }
  0x41   :  { %375 = vmatprep.subr.mxu1 %v197_v40 }
  0x42   :  { %376 = vmatpush3.msra.mxu1 %v197_v40 }
  0x43   :  { %377 = vmatprep.subr.mxu1 %v196_v41 }
  0x44   :  { %378 = vmatpush3.msra.mxu1 %v196_v41 }
  0x45   :  { %379 = vmatprep.subr.mxu1 %v195_v42 }
  0x46   :  { %380 = vmatpush3.msra.mxu1 %v195_v42 }
  0x47   :  { %381 = vmatprep.subr.mxu1 %v194_v43 }
  0x48   :  { %382 = vmatpush3.msra.mxu1 %v194_v43 }
  0xb0   :  { %v67_v4 = vpop.xlane.xlu0 %66 }
  0xb1   :  { %v72_v5 = vmul.f32 0.03125, %v67_v4 }
  0xb3   :  { %v74_v6 = vsub.f32 %v62_v0, %v72_v5 }
  0xb4   :  { %v70_v7 = vpop.xlane.xlu0 %69 }
  0xb5   :  { %v73_v8 = vmul.f32 0.03125, %v70_v7  ;;  %v76_v9 = vmul.f32 %v74_v6, %v74_v6 }
  0xb7   :  { %v75_v10 = vsub.f32 %v63_v1, %v73_v8  ;;  %v78_v11 = vsel %vm64_vm0, %v76_v9, 0.0 }
  0xb8   :  { %79 = vadd.xlane.f32.xlu1 %v78_v11 }
  0xb9   :  { %v77_v12 = vmul.f32 %v75_v10, %v75_v10 }
  0xbb   :  { %v81_v13 = vsel %vm64_vm0, %v77_v12, 0.0 }
  0xbc   :  { %82 = vadd.xlane.f32.xlu1 %v81_v13 }
 0x141   :  { %v80_v21 = vpop.xlane.xlu1 %79 }
 0x142   :  { %v84_v22 = vmul.f32 0.03125, %v80_v21 }
 0x144   :  { %v86_v23 = vadd.f32 1e-05, %v84_v22 }
 0x145   :  { %v83_v24 = vpop.xlane.xlu1 %82 }
 0x146   :  { %392 = vrsqrt.f32 %v86_v23  ;;  %v85_v25 = vmul.f32 0.03125, %v83_v24 }
 0x148   :  { %v87_v26 = vadd.f32 1e-05, %v85_v25 }
 0x14a   :  { %394 = vrsqrt.f32 %v87_v26 }
 0x153   :  { %v393_v27 = vpop.eup %392 }
 0x154   :  { %v90_v28 = vmul.f32 %v393_v27, %v74_v6 }
 0x156   :  { %348 = vmatprep.mubr.msk.f32.mxu0 %vm64_vm0, %v90_v28 }
 0x157   :  { %v395_v29 = vpop.eup %394 }
 0x158   :  { %v91_v30 = vmul.f32 %v395_v29, %v75_v10 }
 0x15a   :  { %349 = vmatmul.mubr.msk.f32.vlgmr.msra.gmra.mxu0 %vm64_vm0, %v91_v30 }
 0x21a   :  { %v350_v45 = vpop.f32.mrf.mxu0 }
 0x21b   :  { %v181_v46 = vadd.f32 %v350_v45, %v312_v44 }
 0x21c   :  { %v175_v47 = vpop.f32.mrf.mxu0 }
 0x21d   :  { %v187_v48 = vmul.f32 0.70710677, %v181_v46  ;;  %v176_v49 = vadd.f32 %v312_v44, %v175_v47  ;;  %v185_v56 = vmul.f32 0.5, %v181_v46 }
 0x21f   :  { %396 = verf.f32 %v187_v48  ;;  %v186_v50 = vmul.f32 0.70710677, %v176_v49  ;;  %v184_v54 = vmul.f32 0.5, %v176_v49 }
 0x221   :  { %398 = verf.f32 %v186_v50 }
 0x22c   :  { %v397_v51 = vpop.eup %396 }
 0x22d   :  { %v191_v53 = vadd.f32 1.0, %v397_v51 }
 0x22e   :  { %v399_v52 = vpop.eup %398 }
 0x22f   :  { %v190_v55 = vadd.f32 1.0, %v399_v52  ;;  %v193_v58 = vmul.f32 %v191_v53, %v185_v56 }
 0x231   :  { %v192_v57 = vmul.f32 %v190_v55, %v184_v54 }
 0x233   :  { %383 = vmatprep.mubr.f32.mxu1 %v192_v57 }
 0x234   :  { %384 = vmatmul.mubr.f32.vlgmr.msra.gmra.mxu1 %v193_v58 }
 0x2f4   :  { %v385_v60 = vpop.f32.mrf.mxu1 }
 0x2f5   :  { %v289_v61 = vadd.f32 %v385_v60, %v315_v59 }
 0x2f6   :  { %v283_v62 = vpop.f32.mrf.mxu1 }
 0x2f7   :  { %293 = vst [vmem:[#allocation8 + $0x8] sm:$0xff] %v289_v61  ;;  %v284_v63 = vadd.f32 %v315_v59, %v283_v62 }
 0x2f9   :  { %292 = vst [vmem:[#allocation8] sm:$0xff] %v284_v63 }
 0x2fa   :  { %471 = shalt.err (!%p468_p5)
}
 0x2fb   :  { %305 = dma.vmem_to_hbm [thread:$0]  %s300_s11, 256, %s563_s5, [#allocation4], %s488_s23, %s488_s23, %s489_s24  }
 0x2fc   :  { %484 = dma.done.wait [#allocation4], 256  }
 0x2fd   :  { %485 = vsyncadd [#allocation4], 4294967040 }
 0x2fe   :  { %309 = vsyncpa [#allocation3], 1 }
 0x2ff   :  { %310 = vsyncpa [#allocation6], 1 }
 0x300   :  { %311 = vsyncpa [#allocation4], 1 }

</bundles_post_ra>
